<compile_context>
chip_gen: v7x
topology: tpu7x:2x2x1
jax: 0.10.0
libtpu: 0.0.40
codegen_flags: <defaults>
</compile_context>

<pallas_src>
import functools

import jax
import jax.numpy as jnp
from jax.experimental import pallas as pl
from jax.experimental.pallas import tpu as pltpu


def _round_up(n, m):
    return ((n + m - 1) // m) * m


def rnn_kernel(x_ref, h0_ref, win_ref, wh_ref, bh_ref, out_ref, h_sc, p_sc,
               *, time_chunk, batch_pad, compute_dtype):
    """One time-chunk of the Elman recurrence.

    x_ref  : (time_chunk * batch_pad, Din)      time-major flattened x chunk
    h0_ref : (batch_pad, Dlat_pad)              initial hidden state (padded)
    win_ref: (Din, Dlat_pad)                    W_in^T (zero-padded)
    wh_ref : (Dlat_pad, Dlat_pad)               W_h^T  (zero-padded)
    bh_ref : (1, Dlat_pad)                      b_h    (zero-padded)
    out_ref: (time_chunk, batch_pad, Dlat_pad)  h_t for this chunk
    h_sc   : (batch_pad, Dlat_pad) f32 VMEM     hidden state carried across chunks
    p_sc   : (time_chunk * batch_pad, Dlat_pad) f32 VMEM  hoisted input projection
    """
    # Initialize the carried hidden state on the first chunk only.
    @pl.when(pl.program_id(0) == 0)
    def _init():
        h_sc[...] = h0_ref[...].astype(jnp.float32)

    # 1) Hoisted input projection for this chunk: ONE MXU matmul (M = time_chunk*batch_pad)
    #    with the bias folded in, accumulated in f32, parked in a VMEM scratch so the
    #    recurrence reads it with cheap 8-aligned ref slices (off the serial chain).
    p_sc[...] = (
        jnp.dot(x_ref[...].astype(compute_dtype),
                win_ref[...].astype(compute_dtype),
                preferred_element_type=jnp.float32)
        + bh_ref[...])

    wh = wh_ref[...].astype(compute_dtype)     # recurrent weight, resident in vregs/VMEM
    h = h_sc[...]                              # (batch_pad, Dlat_pad) f32 carry

    # 2) Serial recurrence: only h @ W_h^T is on the dependency chain.  Each h_t is stored
    #    directly to out_ref[t] as a full lane-dense (batch_pad, Dlat_pad) tile, so exactly
    #    one hidden state stays live (no list, no concatenate).  time_chunk is small and
    #    static; switch to lax.fori_loop(..., unroll=True) if chunks ever get long.
    for t in range(time_chunk):
        pre = p_sc[pl.ds(t * batch_pad, batch_pad), :] + jnp.dot(
            h.astype(compute_dtype), wh, preferred_element_type=jnp.float32)
        h = jnp.maximum(pre, 0.0)              # bias add + ReLU kept in f32
        out_ref[t] = h.astype(out_ref.dtype)

    # 3) Carry h to the next time chunk.
    h_sc[...] = h


def rnn_forward(x, h0, w_in, w_h, b_h, *, time_chunk=None, use_bf16_matmul=False):
    """Matches RNN.forward: returns the stack of h_1..h_S, shape (S, B, Dlat).

    x: (S, B, Din); h0: (B, Dlat); w_in: (Dlat, Din) [input_group.weight, no bias];
    w_h: (Dlat, Dlat) [hidden_group.weight]; b_h: (Dlat,) [hidden_group.bias].
    """
    S, B, Din = x.shape
    Dlat = h0.shape[1]

    # Pad batch to the 8-sublane tile and Dlat to the 128-lane tile so every MXU/VPU op and
    # every store is a full unmasked vreg tile.  Zero padding is exact: padded weight
    # rows/cols and bias entries are 0 and ReLU(0) = 0, so padded h entries stay 0 and never
    # leak into real outputs.
    B_pad = _round_up(max(B, 8), 8)
    Dlat_pad = _round_up(max(Dlat, 128), 128)

    if time_chunk is None:
        time_chunk = S                      # toy shapes: whole sequence resident (grid=(1,))
    assert S % time_chunk == 0, "time_chunk must divide the sequence length"
    n_chunks = S // time_chunk
    rows_per_chunk = time_chunk * B_pad

    compute_dtype = jnp.bfloat16 if use_bf16_matmul else jnp.float32
    f32 = jnp.float32

    x_p = jnp.zeros((S, B_pad, Din), f32).at[:, :B, :].set(x.astype(f32))
    x_flat = x_p.reshape(S * B_pad, Din)                                   # time-major flatten
    h0_p = jnp.zeros((B_pad, Dlat_pad), f32).at[:B, :Dlat].set(h0.astype(f32))
    w_in_t = jnp.zeros((Din, Dlat_pad), f32).at[:, :Dlat].set(w_in.T.astype(f32))
    w_h_t = jnp.zeros((Dlat_pad, Dlat_pad), f32).at[:Dlat, :Dlat].set(w_h.T.astype(f32))
    b_h2 = jnp.zeros((1, Dlat_pad), f32).at[0, :Dlat].set(b_h.astype(f32))

    kernel = functools.partial(rnn_kernel, time_chunk=time_chunk,
                               batch_pad=B_pad, compute_dtype=compute_dtype)

    grid_spec = pltpu.PrefetchScalarGridSpec(
        num_scalar_prefetch=0,
        grid=(n_chunks,),                   # sequential over time chunks (h carried in VMEM)
        in_specs=[
            pl.BlockSpec((rows_per_chunk, Din), lambda i: (i, 0)),     # x chunk (pipelined)
            pl.BlockSpec((B_pad, Dlat_pad), lambda i: (0, 0)),         # h0
            pl.BlockSpec((Din, Dlat_pad), lambda i: (0, 0)),           # W_in^T (resident)
            pl.BlockSpec((Dlat_pad, Dlat_pad), lambda i: (0, 0)),      # W_h^T  (resident)
            pl.BlockSpec((1, Dlat_pad), lambda i: (0, 0)),             # b_h
        ],
        out_specs=pl.BlockSpec((time_chunk, B_pad, Dlat_pad), lambda i: (i, 0, 0)),
        scratch_shapes=[
            pltpu.VMEM((B_pad, Dlat_pad), jnp.float32),                # carried hidden state
            pltpu.VMEM((rows_per_chunk, Dlat_pad), jnp.float32),       # hoisted projection
        ],
    )

    out_p = pl.pallas_call(
        kernel,
        out_shape=jax.ShapeDtypeStruct((S, B_pad, Dlat_pad), jnp.float32),
        grid_spec=grid_spec,
        compiler_params=pltpu.CompilerParams(
            dimension_semantics=("arbitrary",),   # time chunks are sequential (h carry)
            vmem_limit_bytes=32 * 1024 * 1024,    # safe on v5e/v6e/v7x; re-derive + shrink
                                                  # time_chunk for large production Dlat/S
        ),
    )(x_flat, h0_p, w_in_t, w_h_t, b_h2)

    # Strip the sublane/lane padding in the wrapper (layout plumbing, not compute).
    return out_p[:, :B, :Dlat].astype(x.dtype)


def rnn_forward_ref(x, h0, w_in, w_h, b_h):
    """Pure-JAX reference of the PyTorch forward."""
    def step(h, x_t):
        h_new = jax.nn.relu(x_t @ w_in.T + h @ w_h.T + b_h)
        return h_new, h_new
    _, hs = jax.lax.scan(step, h0, x)
    return hs


if __name__ == "__main__":
    # Small shapes consistent with the module: seq=8, batch=2, dim_in=4, dim_latent=32, dim_out=4
    S, B, Din, Dlat, Dout = 8, 2, 4, 32, 4

    key = jax.random.PRNGKey(0)
    k_x, k_h, k_wh, k_bh, k_wi, k_wd, k_bd = jax.random.split(key, 7)

    x = jax.random.normal(k_x, (S, B, Din), dtype=jnp.float32)
    h0 = jax.random.normal(k_h, (B, Dlat), dtype=jnp.float32)

    # nn.Linear-shaped params: weight (out, in), bias (out,)
    w_h = jax.random.normal(k_wh, (Dlat, Dlat), dtype=jnp.float32) * 0.1   # hidden_group.weight
    b_h = jax.random.normal(k_bh, (Dlat,), dtype=jnp.float32) * 0.1        # hidden_group.bias
    w_in = jax.random.normal(k_wi, (Dlat, Din), dtype=jnp.float32) * 0.1   # input_group.weight (bias=False)
    w_dec = jax.random.normal(k_wd, (Dout, Dlat), dtype=jnp.float32) * 0.1
    b_dec = jax.random.normal(k_bd, (Dout,), dtype=jnp.float32) * 0.1
    # TODO(synk): decode() is a plain Linear outside forward(); left to plain JAX (h @ w_dec.T + b_dec).

    ref = rnn_forward_ref(x, h0, w_in, w_h, b_h)

    # f32 path, whole sequence resident (grid=(1,)): must match the f32 reference at 1e-5.
    out = jax.block_until_ready(rnn_forward(x, h0, w_in, w_h, b_h))
    assert out.shape == (S, B, Dlat)
    assert jnp.allclose(out, ref, atol=1e-5, rtol=1e-5)

    # Time-chunked pipelined path (grid=(4,), h carried in VMEM scratch): identical result.
    out_chunked = jax.block_until_ready(rnn_forward(x, h0, w_in, w_h, b_h, time_chunk=2))
    assert jnp.allclose(out_chunked, ref, atol=1e-5, rtol=1e-5)

    # bf16 MXU-operand production path: looser tolerance (bf16 mantissa).
    out_bf16 = jax.block_until_ready(rnn_forward(x, h0, w_in, w_h, b_h, use_bf16_matmul=True))
    assert jnp.allclose(out_bf16, ref, atol=5e-2, rtol=5e-2)

    print("KERNEL_OK")
</pallas_src>

<mosaic_0001>
module attributes {stable_mosaic.version = 11 : i64} {
  func.func @rnn_kernel(%arg0: i32, %arg1: memref<64x4xf32, #tpu.memory_space<vmem>>, %arg2: memref<8x128xf32, #tpu.memory_space<vmem>>, %arg3: memref<4x128xf32, #tpu.memory_space<vmem>>, %arg4: memref<128x128xf32, #tpu.memory_space<vmem>>, %arg5: memref<1x128xf32, #tpu.memory_space<vmem>>, %arg6: memref<8x8x128xf32, #tpu.memory_space<vmem>>, %arg7: memref<8x128xf32, #tpu.memory_space<vmem>>, %arg8: memref<64x128xf32, #tpu.memory_space<vmem>>) attributes {dimension_semantics = [#tpu.dimension_semantics<arbitrary>], iteration_bounds = array<i64: 1>, scalar_prefetch = 0 : i64, scratch_operands = 2 : i64, tpu.core_type = #tpu.core_type<tc>, window_params = [{transform_indices = @transform_0, window_bounds = array<i64: 64, 4>}, {pipeline_mode = #tpu.pipeline_mode<synchronous>, transform_indices = @transform_1, window_bounds = array<i64: 8, 128>}, {pipeline_mode = #tpu.pipeline_mode<synchronous>, transform_indices = @transform_2, window_bounds = array<i64: 4, 128>}, {pipeline_mode = #tpu.pipeline_mode<synchronous>, transform_indices = @transform_3, window_bounds = array<i64: 128, 128>}, {pipeline_mode = #tpu.pipeline_mode<synchronous>, transform_indices = @transform_4, window_bounds = array<i64: 1, 128>}, {transform_indices = @transform_5, window_bounds = array<i64: 8, 8, 128>}]} {
    %c0_i32 = arith.constant 0 : i32
    %0 = arith.cmpi eq, %arg0, %c0_i32 : i32
    %1 = arith.extui %0 : i1 to i32
    %c0_i32_0 = arith.constant 0 : i32
    %2 = arith.cmpi ne, %1, %c0_i32_0 : i32
    scf.if %2 {
      %c0_56 = arith.constant 0 : index
      %c0_57 = arith.constant 0 : index
      %77 = vector.load %arg2[%c0_56, %c0_57] : memref<8x128xf32, #tpu.memory_space<vmem>>, vector<8x128xf32>
      %c0_58 = arith.constant 0 : index
      %c0_59 = arith.constant 0 : index
      %78 = vector.load %arg7[%c0_58, %c0_59] : memref<8x128xf32, #tpu.memory_space<vmem>>, vector<8x128xf32>
      tpu.vector_store %arg7[%c0_58, %c0_59], %77 {strides = array<i32>} : memref<8x128xf32, #tpu.memory_space<vmem>>, vector<8x128xf32>,
    } else {
    }
    %c0 = arith.constant 0 : index
    %c0_1 = arith.constant 0 : index
    %3 = vector.load %arg1[%c0, %c0_1] : memref<64x4xf32, #tpu.memory_space<vmem>>, vector<64x4xf32>
    %c0_2 = arith.constant 0 : index
    %c0_3 = arith.constant 0 : index
    %4 = vector.load %arg3[%c0_2, %c0_3] : memref<4x128xf32, #tpu.memory_space<vmem>>, vector<4x128xf32>
    %cst = arith.constant dense<0.000000e+00> : vector<64x128xf32>
    %5 = tpu.matmul %3, %4, %cst {dimension_numbers = #tpu.dot_dimension_numbers<[1], [0], [0], [1], [0, 0, 1, 1], [], []>} : vector<64x4xf32>, vector<4x128xf32>, vector<64x128xf32> -> vector<64x128xf32>
    %c0_4 = arith.constant 0 : index
    %c0_5 = arith.constant 0 : index
    %6 = vector.load %arg5[%c0_4, %c0_5] : memref<1x128xf32, #tpu.memory_space<vmem>>, vector<1x128xf32>
    %7 = vector.broadcast %6 : vector<1x128xf32> to vector<64x128xf32>
    %8 = arith.addf %5, %7 : vector<64x128xf32>
    %c0_6 = arith.constant 0 : index
    %c0_7 = arith.constant 0 : index
    %9 = vector.load %arg8[%c0_6, %c0_7] : memref<64x128xf32, #tpu.memory_space<vmem>>, vector<64x128xf32>
    tpu.vector_store %arg8[%c0_6, %c0_7], %8 {strides = array<i32>} : memref<64x128xf32, #tpu.memory_space<vmem>>, vector<64x128xf32>,
    %c0_8 = arith.constant 0 : index
    %c0_9 = arith.constant 0 : index
    %10 = vector.load %arg4[%c0_8, %c0_9] : memref<128x128xf32, #tpu.memory_space<vmem>>, vector<128x128xf32>
    %c0_10 = arith.constant 0 : index
    %c0_11 = arith.constant 0 : index
    %11 = vector.load %arg7[%c0_10, %c0_11] : memref<8x128xf32, #tpu.memory_space<vmem>>, vector<8x128xf32>
    %c0_12 = arith.constant 0 : index
    %c0_13 = arith.constant 0 : index
    %12 = vector.load %arg8[%c0_12, %c0_13] : memref<64x128xf32, #tpu.memory_space<vmem>>, vector<8x128xf32>
    %cst_14 = arith.constant dense<0.000000e+00> : vector<8x128xf32>
    %13 = tpu.matmul %11, %10, %cst_14 {dimension_numbers = #tpu.dot_dimension_numbers<[1], [0], [0], [1], [0, 0, 1, 1], [], []>} : vector<8x128xf32>, vector<128x128xf32>, vector<8x128xf32> -> vector<8x128xf32>
    %14 = arith.addf %12, %13 : vector<8x128xf32>
    %cst_15 = arith.constant 0.000000e+00 : f32
    %15 = vector.broadcast %cst_15 : f32 to vector<8x128xf32>
    %16 = arith.maximumf %14, %15 : vector<8x128xf32>
    %c0_16 = arith.constant 0 : index
    %c0_17 = arith.constant 0 : index
    %c0_18 = arith.constant 0 : index
    %17 = vector.load %arg6[%c0_16, %c0_17, %c0_18] : memref<8x8x128xf32, #tpu.memory_space<vmem>>, vector<1x8x128xf32>
    %18 = vector.shape_cast %17 : vector<1x8x128xf32> to vector<8x128xf32>
    %19 = vector.shape_cast %16 : vector<8x128xf32> to vector<1x8x128xf32>
    tpu.vector_store %arg6[%c0_16, %c0_17, %c0_18], %19 {strides = array<i32>} : memref<8x8x128xf32, #tpu.memory_space<vmem>>, vector<1x8x128xf32>,
    %c8 = arith.constant 8 : index
    %c0_19 = arith.constant 0 : index
    %20 = vector.load %arg8[%c8, %c0_19] : memref<64x128xf32, #tpu.memory_space<vmem>>, vector<8x128xf32>
    %cst_20 = arith.constant dense<0.000000e+00> : vector<8x128xf32>
    %21 = tpu.matmul %16, %10, %cst_20 {dimension_numbers = #tpu.dot_dimension_numbers<[1], [0], [0], [1], [0, 0, 1, 1], [], []>} : vector<8x128xf32>, vector<128x128xf32>, vector<8x128xf32> -> vector<8x128xf32>
    %22 = arith.addf %20, %21 : vector<8x128xf32>
    %cst_21 = arith.constant 0.000000e+00 : f32
    %23 = vector.broadcast %cst_21 : f32 to vector<8x128xf32>
    %24 = arith.maximumf %22, %23 : vector<8x128xf32>
    %c1 = arith.constant 1 : index
    %c0_22 = arith.constant 0 : index
    %c0_23 = arith.constant 0 : index
    %25 = vector.load %arg6[%c1, %c0_22, %c0_23] : memref<8x8x128xf32, #tpu.memory_space<vmem>>, vector<1x8x128xf32>
    %26 = vector.shape_cast %25 : vector<1x8x128xf32> to vector<8x128xf32>
    %27 = vector.shape_cast %24 : vector<8x128xf32> to vector<1x8x128xf32>
    tpu.vector_store %arg6[%c1, %c0_22, %c0_23], %27 {strides = array<i32>} : memref<8x8x128xf32, #tpu.memory_space<vmem>>, vector<1x8x128xf32>,
    %c16 = arith.constant 16 : index
    %c0_24 = arith.constant 0 : index
    %28 = vector.load %arg8[%c16, %c0_24] : memref<64x128xf32, #tpu.memory_space<vmem>>, vector<8x128xf32>
    %cst_25 = arith.constant dense<0.000000e+00> : vector<8x128xf32>
    %29 = tpu.matmul %24, %10, %cst_25 {dimension_numbers = #tpu.dot_dimension_numbers<[1], [0], [0], [1], [0, 0, 1, 1], [], []>} : vector<8x128xf32>, vector<128x128xf32>, vector<8x128xf32> -> vector<8x128xf32>
    %30 = arith.addf %28, %29 : vector<8x128xf32>
    %cst_26 = arith.constant 0.000000e+00 : f32
    %31 = vector.broadcast %cst_26 : f32 to vector<8x128xf32>
    %32 = arith.maximumf %30, %31 : vector<8x128xf32>
    %c2 = arith.constant 2 : index
    %c0_27 = arith.constant 0 : index
    %c0_28 = arith.constant 0 : index
    %33 = vector.load %arg6[%c2, %c0_27, %c0_28] : memref<8x8x128xf32, #tpu.memory_space<vmem>>, vector<1x8x128xf32>
    %34 = vector.shape_cast %33 : vector<1x8x128xf32> to vector<8x128xf32>
    %35 = vector.shape_cast %32 : vector<8x128xf32> to vector<1x8x128xf32>
    tpu.vector_store %arg6[%c2, %c0_27, %c0_28], %35 {strides = array<i32>} : memref<8x8x128xf32, #tpu.memory_space<vmem>>, vector<1x8x128xf32>,
    %c24 = arith.constant 24 : index
    %c0_29 = arith.constant 0 : index
    %36 = vector.load %arg8[%c24, %c0_29] : memref<64x128xf32, #tpu.memory_space<vmem>>, vector<8x128xf32>
    %cst_30 = arith.constant dense<0.000000e+00> : vector<8x128xf32>
    %37 = tpu.matmul %32, %10, %cst_30 {dimension_numbers = #tpu.dot_dimension_numbers<[1], [0], [0], [1], [0, 0, 1, 1], [], []>} : vector<8x128xf32>, vector<128x128xf32>, vector<8x128xf32> -> vector<8x128xf32>
    %38 = arith.addf %36, %37 : vector<8x128xf32>
    %cst_31 = arith.constant 0.000000e+00 : f32
    %39 = vector.broadcast %cst_31 : f32 to vector<8x128xf32>
    %40 = arith.maximumf %38, %39 : vector<8x128xf32>
    %c3 = arith.constant 3 : index
    %c0_32 = arith.constant 0 : index
    %c0_33 = arith.constant 0 : index
    %41 = vector.load %arg6[%c3, %c0_32, %c0_33] : memref<8x8x128xf32, #tpu.memory_space<vmem>>, vector<1x8x128xf32>
    %42 = vector.shape_cast %41 : vector<1x8x128xf32> to vector<8x128xf32>
    %43 = vector.shape_cast %40 : vector<8x128xf32> to vector<1x8x128xf32>
    tpu.vector_store %arg6[%c3, %c0_32, %c0_33], %43 {strides = array<i32>} : memref<8x8x128xf32, #tpu.memory_space<vmem>>, vector<1x8x128xf32>,
    %c32 = arith.constant 32 : index
    %c0_34 = arith.constant 0 : index
    %44 = vector.load %arg8[%c32, %c0_34] : memref<64x128xf32, #tpu.memory_space<vmem>>, vector<8x128xf32>
    %cst_35 = arith.constant dense<0.000000e+00> : vector<8x128xf32>
    %45 = tpu.matmul %40, %10, %cst_35 {dimension_numbers = #tpu.dot_dimension_numbers<[1], [0], [0], [1], [0, 0, 1, 1], [], []>} : vector<8x128xf32>, vector<128x128xf32>, vector<8x128xf32> -> vector<8x128xf32>
    %46 = arith.addf %44, %45 : vector<8x128xf32>
    %cst_36 = arith.constant 0.000000e+00 : f32
    %47 = vector.broadcast %cst_36 : f32 to vector<8x128xf32>
    %48 = arith.maximumf %46, %47 : vector<8x128xf32>
    %c4 = arith.constant 4 : index
    %c0_37 = arith.constant 0 : index
    %c0_38 = arith.constant 0 : index
    %49 = vector.load %arg6[%c4, %c0_37, %c0_38] : memref<8x8x128xf32, #tpu.memory_space<vmem>>, vector<1x8x128xf32>
    %50 = vector.shape_cast %49 : vector<1x8x128xf32> to vector<8x128xf32>
    %51 = vector.shape_cast %48 : vector<8x128xf32> to vector<1x8x128xf32>
    tpu.vector_store %arg6[%c4, %c0_37, %c0_38], %51 {strides = array<i32>} : memref<8x8x128xf32, #tpu.memory_space<vmem>>, vector<1x8x128xf32>,
    %c40 = arith.constant 40 : index
    %c0_39 = arith.constant 0 : index
    %52 = vector.load %arg8[%c40, %c0_39] : memref<64x128xf32, #tpu.memory_space<vmem>>, vector<8x128xf32>
    %cst_40 = arith.constant dense<0.000000e+00> : vector<8x128xf32>
    %53 = tpu.matmul %48, %10, %cst_40 {dimension_numbers = #tpu.dot_dimension_numbers<[1], [0], [0], [1], [0, 0, 1, 1], [], []>} : vector<8x128xf32>, vector<128x128xf32>, vector<8x128xf32> -> vector<8x128xf32>
    %54 = arith.addf %52, %53 : vector<8x128xf32>
    %cst_41 = arith.constant 0.000000e+00 : f32
    %55 = vector.broadcast %cst_41 : f32 to vector<8x128xf32>
    %56 = arith.maximumf %54, %55 : vector<8x128xf32>
    %c5 = arith.constant 5 : index
    %c0_42 = arith.constant 0 : index
    %c0_43 = arith.constant 0 : index
    %57 = vector.load %arg6[%c5, %c0_42, %c0_43] : memref<8x8x128xf32, #tpu.memory_space<vmem>>, vector<1x8x128xf32>
    %58 = vector.shape_cast %57 : vector<1x8x128xf32> to vector<8x128xf32>
    %59 = vector.shape_cast %56 : vector<8x128xf32> to vector<1x8x128xf32>
    tpu.vector_store %arg6[%c5, %c0_42, %c0_43], %59 {strides = array<i32>} : memref<8x8x128xf32, #tpu.memory_space<vmem>>, vector<1x8x128xf32>,
    %c48 = arith.constant 48 : index
    %c0_44 = arith.constant 0 : index
    %60 = vector.load %arg8[%c48, %c0_44] : memref<64x128xf32, #tpu.memory_space<vmem>>, vector<8x128xf32>
    %cst_45 = arith.constant dense<0.000000e+00> : vector<8x128xf32>
    %61 = tpu.matmul %56, %10, %cst_45 {dimension_numbers = #tpu.dot_dimension_numbers<[1], [0], [0], [1], [0, 0, 1, 1], [], []>} : vector<8x128xf32>, vector<128x128xf32>, vector<8x128xf32> -> vector<8x128xf32>
    %62 = arith.addf %60, %61 : vector<8x128xf32>
    %cst_46 = arith.constant 0.000000e+00 : f32
    %63 = vector.broadcast %cst_46 : f32 to vector<8x128xf32>
    %64 = arith.maximumf %62, %63 : vector<8x128xf32>
    %c6 = arith.constant 6 : index
    %c0_47 = arith.constant 0 : index
    %c0_48 = arith.constant 0 : index
    %65 = vector.load %arg6[%c6, %c0_47, %c0_48] : memref<8x8x128xf32, #tpu.memory_space<vmem>>, vector<1x8x128xf32>
    %66 = vector.shape_cast %65 : vector<1x8x128xf32> to vector<8x128xf32>
    %67 = vector.shape_cast %64 : vector<8x128xf32> to vector<1x8x128xf32>
    tpu.vector_store %arg6[%c6, %c0_47, %c0_48], %67 {strides = array<i32>} : memref<8x8x128xf32, #tpu.memory_space<vmem>>, vector<1x8x128xf32>,
    %c56 = arith.constant 56 : index
    %c0_49 = arith.constant 0 : index
    %68 = vector.load %arg8[%c56, %c0_49] : memref<64x128xf32, #tpu.memory_space<vmem>>, vector<8x128xf32>
    %cst_50 = arith.constant dense<0.000000e+00> : vector<8x128xf32>
    %69 = tpu.matmul %64, %10, %cst_50 {dimension_numbers = #tpu.dot_dimension_numbers<[1], [0], [0], [1], [0, 0, 1, 1], [], []>} : vector<8x128xf32>, vector<128x128xf32>, vector<8x128xf32> -> vector<8x128xf32>
    %70 = arith.addf %68, %69 : vector<8x128xf32>
    %cst_51 = arith.constant 0.000000e+00 : f32
    %71 = vector.broadcast %cst_51 : f32 to vector<8x128xf32>
    %72 = arith.maximumf %70, %71 : vector<8x128xf32>
    %c7 = arith.constant 7 : index
    %c0_52 = arith.constant 0 : index
    %c0_53 = arith.constant 0 : index
    %73 = vector.load %arg6[%c7, %c0_52, %c0_53] : memref<8x8x128xf32, #tpu.memory_space<vmem>>, vector<1x8x128xf32>
    %74 = vector.shape_cast %73 : vector<1x8x128xf32> to vector<8x128xf32>
    %75 = vector.shape_cast %72 : vector<8x128xf32> to vector<1x8x128xf32>
    tpu.vector_store %arg6[%c7, %c0_52, %c0_53], %75 {strides = array<i32>} : memref<8x8x128xf32, #tpu.memory_space<vmem>>, vector<1x8x128xf32>,
    %c0_54 = arith.constant 0 : index
    %c0_55 = arith.constant 0 : index
    %76 = vector.load %arg7[%c0_54, %c0_55] : memref<8x128xf32, #tpu.memory_space<vmem>>, vector<8x128xf32>
    tpu.vector_store %arg7[%c0_54, %c0_55], %72 {strides = array<i32>} : memref<8x128xf32, #tpu.memory_space<vmem>>, vector<8x128xf32>,
    return
  }
  func.func @transform_0(%arg0: i32) -> (i32, i32) {
    %c0_i32 = arith.constant 0 : i32
    %c0_i32_0 = arith.constant 0 : i32
    return %arg0, %c0_i32 : i32, i32
  }
  func.func @transform_1(%arg0: i32) -> (i32, i32) {
    %c0_i32 = arith.constant 0 : i32
    %c0_i32_0 = arith.constant 0 : i32
    %c0_i32_1 = arith.constant 0 : i32
    return %c0_i32, %c0_i32_0 : i32, i32
  }
  func.func @transform_2(%arg0: i32) -> (i32, i32) {
    %c0_i32 = arith.constant 0 : i32
    %c0_i32_0 = arith.constant 0 : i32
    %c0_i32_1 = arith.constant 0 : i32
    return %c0_i32, %c0_i32_0 : i32, i32
  }
  func.func @transform_3(%arg0: i32) -> (i32, i32) {
    %c0_i32 = arith.constant 0 : i32
    %c0_i32_0 = arith.constant 0 : i32
    %c0_i32_1 = arith.constant 0 : i32
    return %c0_i32, %c0_i32_0 : i32, i32
  }
  func.func @transform_4(%arg0: i32) -> (i32, i32) {
    %c0_i32 = arith.constant 0 : i32
    %c0_i32_0 = arith.constant 0 : i32
    %c0_i32_1 = arith.constant 0 : i32
    return %c0_i32, %c0_i32_0 : i32, i32
  }
  func.func @transform_5(%arg0: i32) -> (i32, i32, i32) {
    %c0_i32 = arith.constant 0 : i32
    %c0_i32_0 = arith.constant 0 : i32
    %c0_i32_1 = arith.constant 0 : i32
    return %arg0, %c0_i32, %c0_i32_0 : i32, i32, i32
  }
}

</mosaic_0001>

<bundles_post_ra>
// kernel: tpu_custom_call.1
= control target key start
LH: loop header
LB: loop body
LE: loop exit
PB: predicated region body
PF: predicated region fallthrough
CT: control target
= control target key end

     0   :  { %10 = vsyncpa [#allocation5], 0  ;;  %s1822_s0 = inlined_call_operand.vmem [shape: f32[64,4], index: 0, kind: input, shape index: {}]   ;;  %s1823_s1 = inlined_call_operand.vmem [shape: f32[8,128], index: 1, kind: input, shape index: {}]   ;;  %s1824_s2 = inlined_call_operand.vmem [shape: f32[4,128], index: 2, kind: input, shape index: {}]   ;;  %s1825_s3 = inlined_call_operand.hbm [shape: f32[128,128], index: 3, kind: input, shape index: {}]   ;;  %s1826_s4 = inlined_call_operand.vmem [shape: f32[1,128], index: 4, kind: input, shape index: {}]   ;;  %s1827_s5 = inlined_call_operand.hbm [shape: f32[8,8,128], index: 5, kind: output, shape index: {}]  }
   0x1   :  { %11 = vsyncpa [#allocation6], 0  ;;  %s1529_s18 = smov [#allocation4]   ;;  %s1481_s22 = scalar_lea.hbm %s1825_s3, 2048 }
   0x2   :  { %s23_s19 = sshll.u32 %s1529_s18, 4  ;;  %p1482_p0 = scmp.ne.s32.totalorder %s1825_s3, %s1481_s22  ;;  %s24_s19 = int_to_ptr.vmem [resolvable:$true] %s23_s19 }
   0x3   :  { %p1485_p1 = scmp.lt.u32.totalorder %s1481_s22, %s1825_s3 }
   0x5   :  { %p1487_p2 = pnand %p1485_p1, %p1482_p0 }
   0x7   :  { %1490 = shalt.err (!%p1487_p2)
}
   0x8   :  { %s1491_s27 = scalar_lea.vmem %s24_s19, 2048  ;;  %p1496_p4 = scmp.lt.s32.totalorder %s24_s19, %s24_s19 }
   0x9   :  { %p1492_p3 = scmp.ne.s32.totalorder %s24_s19, %s1491_s27  ;;  %p1497_p5 = scmp.lt.s32.totalorder %s1491_s27, %s1491_s27 }
   0xb   :  { %p1498_p6 = por %p1497_p5, %p1496_p4 }
   0xd   :  { %p1499_p7 = pnand %p1498_p6, %p1492_p3 }
   0xf   :  { %1502 = shalt.err (!%p1499_p7)
}
  0x10   :  { %s1530_s28 = smov 128   ;;  %s1531_s29 = smov 8  }
  0x11   :  { %29 = dma.hbm_to_vmem [thread:$0]  %s1825_s3, 2048, %s24_s19, [#allocation5], %s1530_s28, %s1530_s28, %s1531_s29  }
  0x12   :  { %1525 = dma.done.wait [#allocation5], 2048  }
  0x13   :  { %1526 = vsyncadd [#allocation5], 4294965248  ;;  %v1532_v0 = vmov 0.0|0.0   ;;  %vm1533_vm0 = vmmov 0   ;;  %v1534_v1 = vmov 0.0   ;;  %v199_v2 = vld [vmem:[#allocation4] sm:$0xff] }
  0x14   :  { %1282 = vmatprep.subr.bf16.mxu1 %v1532_v0  ;;  %1034 = vmatprep.mubr.msk.f32.mxu1 %vm1533_vm0, %v1534_v1  ;;  %v200_v3 = vld [vmem:[#allocation4 + $0x8] sm:$0xff]  ;;  %v201_v4 = vld [vmem:[#allocation4 + $0x10] sm:$0xff]  ;;  %v202_v6 = vld [vmem:[#allocation4 + $0x18] sm:$0xff]  ;;  %vm82_vm1 = vcmask 1043456   ;;  %vm57_vm2 = vcmask 31744  }
  0x15   :  { %v1584_v5 = vpack.c.bf16 %v200_v3, %v199_v2  ;;  %v1587_v7 = vpack.c.bf16 %v202_v6, %v201_v4  ;;  %v203_v8 = vld [vmem:[#allocation4 + $0x20] sm:$0xff]  ;;  %v204_v9 = vld [vmem:[#allocation4 + $0x28] sm:$0xff]  ;;  %v43_v13 = vld [vmem:[%s1822_s0 + $0x10] sm:$0xff] }
  0x16   :  { %v49_v10 = vld [vmem:[%s1824_s2] sm:$0xf]  ;;  %v42_v12 = vld [vmem:[%s1822_s0 + $0x8] sm:$0xff]  ;;  %v1604_v14 = vpack.c.bf16 %v204_v9, %v203_v8  ;;  %v205_v15 = vld [vmem:[#allocation4 + $0x30] sm:$0xff] }
  0x17   :  { %1284 = vmatpush3.bf16.msra.mxu1 %v1584_v5  ;;  %988 = vmatprep.subr.msk.mxu0 %vm82_vm1, %v49_v10  ;;  %v41_v11 = vld [vmem:[%s1822_s0] sm:$0xff]  ;;  %v206_v16 = vld [vmem:[#allocation4 + $0x38] sm:$0xff]  ;;  %v208_v21 = vld [vmem:[#allocation4 + $0x48] sm:$0xff] }
  0x18   :  { %1285 = vmatprep.subr.bf16.mxu1 %v1532_v0  ;;  %989 = vmatpush3.msk.msra.mxu0 %vm82_vm1, %v49_v10  ;;  %v44_v17 = vld [vmem:[%s1822_s0 + $0x18] sm:$0xff]  ;;  %v45_v18 = vld [vmem:[%s1822_s0 + $0x20] sm:$0xff]  ;;  %v1619_v19 = vpack.c.bf16 %v206_v16, %v205_v15  ;;  %v209_v23 = vld [vmem:[#allocation4 + $0x50] sm:$0xff] }
  0x19   :  { %990 = vmatprep.mubr.msk.f32.mxu0 %vm57_vm2, %v41_v11  ;;  %1306 = vmatprep.subr.bf16.mxu0 %v1532_v0  ;;  %v207_v20 = vld [vmem:[#allocation4 + $0x40] sm:$0xff]  ;;  %v210_v24 = vld [vmem:[#allocation4 + $0x58] sm:$0xff]  ;;  %v212_v27 = vld [vmem:[#allocation4 + $0x68] sm:$0xff] }
  0x1a   :  { %991 = vmatmul.mubr.msk.f32.vlgmr.msra.gmra.mrb[0].mxu0 %vm57_vm2, %v42_v12  ;;  %v1627_v22 = vpack.c.bf16 %v208_v21, %v207_v20  ;;  %v1633_v25 = vpack.c.bf16 %v210_v24, %v209_v23  ;;  %v211_v26 = vld [vmem:[#allocation4 + $0x60] sm:$0xff]  ;;  %v213_v29 = vld [vmem:[#allocation4 + $0x70] sm:$0xff]  ;;  %v214_v30 = vld [vmem:[#allocation4 + $0x78] sm:$0xff] }
  0x1b   :  { %1287 = vmatpush3.bf16.msra.mxu1 %v1587_v7  ;;  %1308 = vmatpush3.bf16.msra.mxu0 %v1584_v5  ;;  %v1639_v28 = vpack.c.bf16 %v212_v27, %v211_v26  ;;  %v1645_v31 = vpack.c.bf16 %v214_v30, %v213_v29  ;;  %v39_v32 = vld [vmem:[%s1823_s1] sm:$0xff]  ;;  %v46_v33 = vld [vmem:[%s1822_s0 + $0x28] sm:$0xff]  ;;  %v47_v34 = vld [vmem:[%s1822_s0 + $0x30] sm:$0xff] }
  0x1c   :  { %1288 = vmatprep.subr.bf16.mxu1 %v1532_v0  ;;  %993 = vmatprep.mubr.msk.f32.mxu0 %vm57_vm2, %v43_v13  ;;  %v48_v35 = vld [vmem:[%s1822_s0 + $0x38] sm:$0xff]  ;;  %v1696_v40 = vld [vmem:[%s1826_s4] ss:$0 sm:$0xff]  ;;  %s1535_s0 = smov [#allocation7]  }
  0x1d   :  { %1309 = vmatprep.subr.bf16.mxu0 %v1532_v0  ;;  %s821_s4 = sshll.u32 %s1535_s0, 4  ;;  %s822_s4 = int_to_ptr.vmem [resolvable:$true] %s821_s4 }
  0x1e   :  { %994 = vmatmul.mubr.msk.f32.gmra.mrb[2].mxu0 %vm57_vm2, %v44_v17  ;;  %s1503_s26 = scalar_lea.vmem %s822_s4, 1024  ;;  %p1508_p9 = scmp.lt.s32.totalorder %s822_s4, %s822_s4 }
  0x1f   :  { %1290 = vmatpush3.bf16.msra.mxu1 %v1604_v14  ;;  %996 = vmatprep.mubr.msk.f32.mxu0 %vm57_vm2, %v45_v18  ;;  %p1504_p8 = scmp.ne.s32.totalorder %s822_s4, %s1503_s26  ;;  %p1509_p10 = scmp.lt.s32.totalorder %s1503_s26, %s1503_s26 }
  0x20   :  { %1291 = vmatprep.subr.bf16.mxu1 %v1532_v0  ;;  %1311 = vmatpush3.bf16.msra.mxu0 %v1587_v7 }
  0x21   :  { %1312 = vmatprep.subr.bf16.mxu0 %v1532_v0  ;;  %p1510_p11 = por %p1509_p10, %p1508_p9 }
  0x22   :  { %997 = vmatmul.mubr.msk.f32.gmra.mrb[4].mxu0 %vm57_vm2, %v46_v33 }
  0x23   :  { %1293 = vmatpush3.bf16.msra.mxu1 %v1619_v19  ;;  %999 = vmatprep.mubr.msk.f32.mxu0 %vm57_vm2, %v47_v34  ;;  %p1511_p12 = pnand %p1510_p11, %p1504_p8 }
  0x24   :  { %1294 = vmatprep.subr.bf16.mxu1 %v1532_v0  ;;  %1314 = vmatpush3.bf16.msra.mxu0 %v1604_v14 }
  0x25   :  { %1315 = vmatprep.subr.bf16.mxu0 %v1532_v0 }
  0x26   :  { %1000 = vmatmul.mubr.msk.f32.gmra.mrb[6].mxu0 %vm57_vm2, %v48_v35 }
  0x27   :  { %1296 = vmatpush3.bf16.msra.mxu1 %v1627_v22  ;;  %1069 = vmatprep.mubr.msk.f32.mxu0 %vm1533_vm0, %v1534_v1 }
  0x28   :  { %1297 = vmatprep.subr.bf16.mxu1 %v1532_v0  ;;  %1317 = vmatpush3.bf16.msra.mxu0 %v1619_v19 }
  0x29   :  { %1318 = vmatprep.subr.bf16.mxu0 %v1532_v0 }
  0x2b   :  { %1299 = vmatpush3.bf16.msra.mxu1 %v1633_v25 }
  0x2c   :  { %1300 = vmatprep.subr.bf16.mxu1 %v1532_v0  ;;  %1320 = vmatpush3.bf16.msra.mxu0 %v1627_v22 }
  0x2d   :  { %1321 = vmatprep.subr.bf16.mxu0 %v1532_v0 }
  0x2f   :  { %1302 = vmatpush3.bf16.msra.mxu1 %v1639_v28 }
  0x30   :  { %1303 = vmatprep.subr.bf16.mxu1 %v1532_v0  ;;  %1323 = vmatpush3.bf16.msra.mxu0 %v1633_v25 }
  0x31   :  { %1324 = vmatprep.subr.bf16.mxu0 %v1532_v0 }
  0x33   :  { %1305 = vmatpush3.bf16.msra.mxu1 %v1645_v31 }
  0x34   :  { %1330 = vmatprep.subr.bf16.mxu1 %v1532_v0  ;;  %1326 = vmatpush3.bf16.msra.mxu0 %v1639_v28 }
  0x35   :  { %1327 = vmatprep.subr.bf16.mxu0 %v1532_v0 }
  0x36   :  { %1035 = vmatmul.mubr.f32.vlgmr.msra.gmra.mrb[0].mxu1 %v39_v32 }
  0x37   :  { %1332 = vmatpush3.bf16.msra.mxu1 %v1584_v5  ;;  %1104 = vmatprep.mubr.msk.f32.mxu1 %vm1533_vm0, %v1534_v1 }
  0x38   :  { %1333 = vmatprep.subr.bf16.mxu1 %v1532_v0  ;;  %1329 = vmatpush3.bf16.msra.mxu0 %v1645_v31 }
  0x39   :  { %1354 = vmatprep.subr.bf16.mxu0 %v1532_v0 }
  0x3b   :  { %1335 = vmatpush3.bf16.msra.mxu1 %v1587_v7 }
  0x3c   :  { %1336 = vmatprep.subr.bf16.mxu1 %v1532_v0 }
  0x3f   :  { %1338 = vmatpush3.bf16.msra.mxu1 %v1604_v14 }
  0x40   :  { %1339 = vmatprep.subr.bf16.mxu1 %v1532_v0 }
  0x43   :  { %1341 = vmatpush3.bf16.msra.mxu1 %v1619_v19 }
  0x44   :  { %1342 = vmatprep.subr.bf16.mxu1 %v1532_v0 }
  0x47   :  { %1344 = vmatpush3.bf16.msra.mxu1 %v1627_v22 }
  0x48   :  { %1345 = vmatprep.subr.bf16.mxu1 %v1532_v0 }
  0x4b   :  { %1347 = vmatpush3.bf16.msra.mxu1 %v1633_v25 }
  0x4c   :  { %1348 = vmatprep.subr.bf16.mxu1 %v1532_v0 }
  0x4f   :  { %1350 = vmatpush3.bf16.msra.mxu1 %v1639_v28 }
  0x50   :  { %1351 = vmatprep.subr.bf16.mxu1 %v1532_v0 }
  0x53   :  { %1353 = vmatpush3.bf16.msra.mxu1 %v1645_v31 }
  0x54   :  { %1378 = vmatprep.subr.bf16.mxu1 %v1532_v0 }
  0xed   :  { %v992_v36 = vpop.f32.mrb[0].mxu0 }
  0xee   :  { %v152_v37 = vpop.f32.mrb[1].mxu0  ;;  %v158_v50 = vadd.f32 %v992_v36, %v1696_v40 }
  0xef   :  { %v153_v41 = vadd.f32 %v1696_v40, %v152_v37 }
  0xf1   :  { %v1691_v38 = vpop.f32.mrb[2].mxu0 }
  0xf2   :  { %v162_v39 = vpop.f32.mrb[3].mxu0  ;;  %v168_v60 = vadd.f32 %v1691_v38, %v1696_v40 }
  0xf3   :  { %v163_v55 = vadd.f32 %v1696_v40, %v162_v39 }
  0xf5   :  { %v1717_v46 = vpop.f32.mrb[4].mxu0 }
  0xf6   :  { %v1719_v47 = vpop.f32.mrb[5].mxu0 }
  0xf7   :  { %v173_v3 = vadd.f32 %v1696_v40, %v1719_v47 }
  0xf9   :  { %v1721_v48 = vpop.f32.mrb[6].mxu0 }
  0xfa   :  { %v1723_v49 = vpop.f32.mrb[7].mxu0 }
  0xfb   :  { %v183_v12 = vadd.f32 %v1696_v40, %v1723_v49 }
 0x109   :  { %v283_v42 = vpop.f32.mrb[0].mxu1 }
 0x10a   :  { %v287_v43 = vadd.f32 %v283_v42, %v153_v41  ;;  %v1036_v44 = vpop.f32.mrb[1].mxu1 }
 0x10c   :  { %v288_v45 = vmax.f32 %v287_v43, 0.0 }
 0x10e   :  { %289 = vst [vmem:[#allocation7] sm:$0xff] %v288_v45  ;;  %1070 = vmatmul.mubr.f32.vlgmr.msra.gmra.mrb[8].mxu0 %v288_v45 }
 0x10f   :  { %1356 = vmatpush3.bf16.msra.mxu0 %v1584_v5  ;;  %1139 = vmatprep.mubr.msk.f32.mxu0 %vm1533_vm0, %v1534_v1 }
 0x110   :  { %1357 = vmatprep.subr.bf16.mxu0 %v1532_v0 }
 0x113   :  { %1359 = vmatpush3.bf16.msra.mxu0 %v1587_v7 }
 0x114   :  { %1360 = vmatprep.subr.bf16.mxu0 %v1532_v0 }
 0x117   :  { %1362 = vmatpush3.bf16.msra.mxu0 %v1604_v14 }
 0x118   :  { %1363 = vmatprep.subr.bf16.mxu0 %v1532_v0 }
 0x11b   :  { %1365 = vmatpush3.bf16.msra.mxu0 %v1619_v19 }
 0x11c   :  { %1366 = vmatprep.subr.bf16.mxu0 %v1532_v0 }
 0x11f   :  { %1368 = vmatpush3.bf16.msra.mxu0 %v1627_v22 }
 0x120   :  { %1369 = vmatprep.subr.bf16.mxu0 %v1532_v0 }
 0x123   :  { %1371 = vmatpush3.bf16.msra.mxu0 %v1633_v25 }
 0x124   :  { %1372 = vmatprep.subr.bf16.mxu0 %v1532_v0 }
 0x127   :  { %1374 = vmatpush3.bf16.msra.mxu0 %v1639_v28 }
 0x128   :  { %1375 = vmatprep.subr.bf16.mxu0 %v1532_v0 }
 0x12b   :  { %1377 = vmatpush3.bf16.msra.mxu0 %v1645_v31 }
 0x12c   :  { %1402 = vmatprep.subr.bf16.mxu0 %v1532_v0 }
 0x1e1   :  { %v357_v51 = vpop.f32.mrb[8].mxu0 }
 0x1e2   :  { %v361_v52 = vadd.f32 %v357_v51, %v158_v50  ;;  %v1071_v53 = vpop.f32.mrb[9].mxu0 }
 0x1e4   :  { %v362_v54 = vmax.f32 %v361_v52, 0.0 }
 0x1e6   :  { %364 = vst [vmem:[#allocation7 + $0x8] sm:$0xff] %v362_v54  ;;  %1105 = vmatmul.mubr.f32.vlgmr.msra.gmra.mrb[2].mxu1 %v362_v54 }
 0x1e7   :  { %1380 = vmatpush3.bf16.msra.mxu1 %v1584_v5  ;;  %1174 = vmatprep.mubr.msk.f32.mxu1 %vm1533_vm0, %v1534_v1 }
 0x1e8   :  { %1381 = vmatprep.subr.bf16.mxu1 %v1532_v0 }
 0x1eb   :  { %1383 = vmatpush3.bf16.msra.mxu1 %v1587_v7 }
 0x1ec   :  { %1384 = vmatprep.subr.bf16.mxu1 %v1532_v0 }
 0x1ef   :  { %1386 = vmatpush3.bf16.msra.mxu1 %v1604_v14 }
 0x1f0   :  { %1387 = vmatprep.subr.bf16.mxu1 %v1532_v0 }
 0x1f3   :  { %1389 = vmatpush3.bf16.msra.mxu1 %v1619_v19 }
 0x1f4   :  { %1390 = vmatprep.subr.bf16.mxu1 %v1532_v0 }
 0x1f7   :  { %1392 = vmatpush3.bf16.msra.mxu1 %v1627_v22 }
 0x1f8   :  { %1393 = vmatprep.subr.bf16.mxu1 %v1532_v0 }
 0x1fb   :  { %1395 = vmatpush3.bf16.msra.mxu1 %v1633_v25 }
 0x1fc   :  { %1396 = vmatprep.subr.bf16.mxu1 %v1532_v0 }
 0x1ff   :  { %1398 = vmatpush3.bf16.msra.mxu1 %v1639_v28 }
 0x200   :  { %1399 = vmatprep.subr.bf16.mxu1 %v1532_v0 }
 0x203   :  { %1401 = vmatpush3.bf16.msra.mxu1 %v1645_v31 }
 0x204   :  { %1426 = vmatprep.subr.bf16.mxu1 %v1532_v0 }
 0x2b9   :  { %v432_v56 = vpop.f32.mrb[2].mxu1 }
 0x2ba   :  { %v436_v57 = vadd.f32 %v432_v56, %v163_v55  ;;  %v1106_v58 = vpop.f32.mrb[3].mxu1 }
 0x2bc   :  { %v437_v59 = vmax.f32 %v436_v57, 0.0 }
 0x2be   :  { %439 = vst [vmem:[#allocation7 + $0x10] sm:$0xff] %v437_v59  ;;  %1140 = vmatmul.mubr.f32.vlgmr.msra.gmra.mrb[10].mxu0 %v437_v59 }
 0x2bf   :  { %1404 = vmatpush3.bf16.msra.mxu0 %v1584_v5  ;;  %1209 = vmatprep.mubr.msk.f32.mxu0 %vm1533_vm0, %v1534_v1 }
 0x2c0   :  { %1405 = vmatprep.subr.bf16.mxu0 %v1532_v0 }
 0x2c3   :  { %1407 = vmatpush3.bf16.msra.mxu0 %v1587_v7 }
 0x2c4   :  { %1408 = vmatprep.subr.bf16.mxu0 %v1532_v0 }
 0x2c7   :  { %1410 = vmatpush3.bf16.msra.mxu0 %v1604_v14 }
 0x2c8   :  { %1411 = vmatprep.subr.bf16.mxu0 %v1532_v0 }
 0x2cb   :  { %1413 = vmatpush3.bf16.msra.mxu0 %v1619_v19 }
 0x2cc   :  { %1414 = vmatprep.subr.bf16.mxu0 %v1532_v0 }
 0x2cf   :  { %1416 = vmatpush3.bf16.msra.mxu0 %v1627_v22 }
 0x2d0   :  { %1417 = vmatprep.subr.bf16.mxu0 %v1532_v0 }
 0x2d3   :  { %1419 = vmatpush3.bf16.msra.mxu0 %v1633_v25 }
 0x2d4   :  { %1420 = vmatprep.subr.bf16.mxu0 %v1532_v0 }
 0x2d7   :  { %1422 = vmatpush3.bf16.msra.mxu0 %v1639_v28 }
 0x2d8   :  { %1423 = vmatprep.subr.bf16.mxu0 %v1532_v0 }
 0x2db   :  { %1425 = vmatpush3.bf16.msra.mxu0 %v1645_v31 }
 0x2dc   :  { %1450 = vmatprep.subr.bf16.mxu0 %v1532_v0 }
 0x391   :  { %v507_v61 = vpop.f32.mrb[10].mxu0 }
 0x392   :  { %v511_v62 = vadd.f32 %v507_v61, %v168_v60  ;;  %v1141_v63 = vpop.f32.mrb[11].mxu0 }
 0x394   :  { %v512_v2 = vmax.f32 %v511_v62, 0.0 }
 0x396   :  { %514 = vst [vmem:[#allocation7 + $0x18] sm:$0xff] %v512_v2  ;;  %1175 = vmatmul.mubr.f32.vlgmr.msra.gmra.mrb[4].mxu1 %v512_v2 }
 0x397   :  { %1428 = vmatpush3.bf16.msra.mxu1 %v1584_v5  ;;  %1244 = vmatprep.mubr.msk.f32.mxu1 %vm1533_vm0, %v1534_v1 }
 0x398   :  { %1429 = vmatprep.subr.bf16.mxu1 %v1532_v0 }
 0x39b   :  { %1431 = vmatpush3.bf16.msra.mxu1 %v1587_v7 }
 0x39c   :  { %1432 = vmatprep.subr.bf16.mxu1 %v1532_v0 }
 0x39f   :  { %1434 = vmatpush3.bf16.msra.mxu1 %v1604_v14 }
 0x3a0   :  { %1435 = vmatprep.subr.bf16.mxu1 %v1532_v0 }
 0x3a3   :  { %1437 = vmatpush3.bf16.msra.mxu1 %v1619_v19 }
 0x3a4   :  { %1438 = vmatprep.subr.bf16.mxu1 %v1532_v0 }
 0x3a7   :  { %1440 = vmatpush3.bf16.msra.mxu1 %v1627_v22 }
 0x3a8   :  { %1441 = vmatprep.subr.bf16.mxu1 %v1532_v0 }
 0x3ab   :  { %1443 = vmatpush3.bf16.msra.mxu1 %v1633_v25 }
 0x3ac   :  { %1444 = vmatprep.subr.bf16.mxu1 %v1532_v0 }
 0x3af   :  { %1446 = vmatpush3.bf16.msra.mxu1 %v1639_v28 }
 0x3b0   :  { %1447 = vmatprep.subr.bf16.mxu1 %v1532_v0 }
 0x3b3   :  { %1449 = vmatpush3.bf16.msra.mxu1 %v1645_v31 }
 0x469   :  { %v582_v4 = vpop.f32.mrb[4].mxu1 }
 0x46a   :  { %v586_v6 = vadd.f32 %v582_v4, %v173_v3  ;;  %v1176_v8 = vpop.f32.mrb[5].mxu1 }
 0x46c   :  { %v587_v9 = vmax.f32 %v586_v6, 0.0 }
 0x46e   :  { %589 = vst [vmem:[#allocation7 + $0x20] sm:$0xff] %v587_v9  ;;  %1210 = vmatmul.mubr.f32.vlgmr.msra.gmra.mrb[12].mxu0 %v587_v9 }
 0x46f   :  { %1452 = vmatpush3.bf16.msra.mxu0 %v1584_v5  ;;  %1279 = vmatprep.mubr.msk.f32.mxu0 %vm1533_vm0, %v1534_v1  ;;  %v178_v1 = vadd.f32 %v1717_v46, %v1696_v40 }
 0x470   :  { %1453 = vmatprep.subr.bf16.mxu0 %v1532_v0 }
 0x473   :  { %1455 = vmatpush3.bf16.msra.mxu0 %v1587_v7 }
 0x474   :  { %1456 = vmatprep.subr.bf16.mxu0 %v1532_v0 }
 0x477   :  { %1458 = vmatpush3.bf16.msra.mxu0 %v1604_v14 }
 0x478   :  { %1459 = vmatprep.subr.bf16.mxu0 %v1532_v0 }
 0x47b   :  { %1461 = vmatpush3.bf16.msra.mxu0 %v1619_v19 }
 0x47c   :  { %1462 = vmatprep.subr.bf16.mxu0 %v1532_v0 }
 0x47f   :  { %1464 = vmatpush3.bf16.msra.mxu0 %v1627_v22 }
 0x480   :  { %1465 = vmatprep.subr.bf16.mxu0 %v1532_v0 }
 0x483   :  { %1467 = vmatpush3.bf16.msra.mxu0 %v1633_v25 }
 0x484   :  { %1468 = vmatprep.subr.bf16.mxu0 %v1532_v0 }
 0x487   :  { %1470 = vmatpush3.bf16.msra.mxu0 %v1639_v28 }
 0x488   :  { %1471 = vmatprep.subr.bf16.mxu0 %v1532_v0  ;;  %v188_v0 = vadd.f32 %v1721_v48, %v1696_v40 }
 0x48b   :  { %1473 = vmatpush3.bf16.msra.mxu0 %v1645_v31 }
 0x541   :  { %v657_v5 = vpop.f32.mrb[12].mxu0 }
 0x542   :  { %v661_v7 = vadd.f32 %v657_v5, %v178_v1  ;;  %v1211_v10 = vpop.f32.mrb[13].mxu0 }
 0x544   :  { %v662_v11 = vmax.f32 %v661_v7, 0.0 }
 0x546   :  { %664 = vst [vmem:[#allocation7 + $0x28] sm:$0xff] %v662_v11  ;;  %1245 = vmatmul.mubr.f32.vlgmr.msra.gmra.mrb[6].mxu1 %v662_v11 }
 0x619   :  { %v732_v13 = vpop.f32.mrb[6].mxu1 }
 0x61a   :  { %v736_v14 = vadd.f32 %v732_v13, %v183_v12  ;;  %v1246_v15 = vpop.f32.mrb[7].mxu1 }
 0x61c   :  { %v737_v16 = vmax.f32 %v736_v14, 0.0 }
 0x61e   :  { %739 = vst [vmem:[#allocation7 + $0x30] sm:$0xff] %v737_v16  ;;  %1280 = vmatmul.mubr.f32.vlgmr.msra.gmra.mrb[14].mxu0 %v737_v16 }
 0x6f1   :  { %v807_v17 = vpop.f32.mrb[14].mxu0 }
 0x6f2   :  { %v811_v18 = vadd.f32 %v807_v17, %v188_v0  ;;  %v1281_v19 = vpop.f32.mrb[15].mxu0 }
 0x6f4   :  { %v812_v20 = vmax.f32 %v811_v18, 0.0 }
 0x6f6   :  { %814 = vst [vmem:[#allocation7 + $0x38] sm:$0xff] %v812_v20 }
 0x6f7   :  { %1514 = shalt.err (!%p1511_p12)
}
 0x6f8   :  { %s1515_s6 = scalar_lea.hbm %s1827_s5, 1024 }
 0x6f9   :  { %p1516_p13 = scmp.ne.s32.totalorder %s1827_s5, %s1515_s6  ;;  %p1519_p0 = scmp.lt.u32.totalorder %s1515_s6, %s1827_s5 }
 0x6fb   :  { %p1521_p1 = pnand %p1519_p0, %p1516_p13 }
 0x6fd   :  { %1524 = shalt.err (!%p1521_p1)
}
 0x6fe   :  { %827 = dma.vmem_to_hbm [thread:$0]  %s822_s4, 1024, %s1827_s5, [#allocation6], %s1530_s28, %s1530_s28, %s1531_s29  }
 0x6ff   :  { %1527 = dma.done.wait [#allocation6], 1024  }
 0x700   :  { %1528 = vsyncadd [#allocation6], 4294966272 }
 0x701   :  { %831 = vsyncpa [#allocation5], 1 }
 0x702   :  { %832 = vsyncpa [#allocation6], 1 }

</bundles_post_ra>
